<compile_context>
chip_gen: v7x
topology: tpu7x:2x2x1
jax: 0.10.0
libtpu: 0.0.40
codegen_flags: <defaults>
</compile_context>

<pallas_src>
import jax
import jax.numpy as jnp
from jax.experimental import pallas as pl
from jax.experimental.pallas import tpu as pltpu

HIDDEN_SIZE = 32               # nn.GRUCell hidden size (global in the repo)
INPUT_SIZE = 2 * HIDDEN_SIZE   # "2 * hidden" boundary vectors per docstring
BATCH = 256                    # documents per call (2 blocks of 128 lanes)
BLOCK_B = 128                  # documents per grid block (lane width)
SEQ_LEN = 8                    # split_num (decode steps per document)


def gru_seq_kernel(x_ref, m_ref, h0_ref, wih_ref, whh_ref, bgi_ref, bhn_ref,
                   out_ref, gi_ref):
    """Masked sequential GRU decode for one block of documents (batch on lanes).

    x_ref   : (T, I, BB)   per-step boundary vectors (feature on sublanes)
    m_ref   : (T, 1, BB)   per-step validity mask (all-ones for forward)
    h0_ref  : (H, BB)      initial hidden state
    wih_ref : (3H, I)      weight_ih, gate order (r, z, n)
    whh_ref : (3H, H)      weight_hh
    bgi_ref : (3H, 1)      b_ih with b_hh's r/z parts folded in
    bhn_ref : (H, 1)       b_hh n-part (must stay inside the r-scaled term)
    out_ref : (T, H, BB)   masked hidden state after every step
    gi_ref  : (T, 3H, BB)  VMEM scratch: input-side gate pre-activations
    """
    T, I, BB = x_ref.shape
    H = h0_ref.shape[0]

    wih = wih_ref[...]
    whh = whh_ref[...]
    # Hoisted bias broadcasts (JAX does not CSE broadcast_in_dim in loops).
    bgi = jnp.broadcast_to(bgi_ref[...], (3 * H, BB))
    bhn = jnp.broadcast_to(bhn_ref[...], (H, BB))

    # ---- Phase 1: input-side gate pre-activations for ALL steps.
    # x does not depend on the recurrence, so these MXU passes sit off the
    # serial chain.  Input masking (run_batch: inputs * masks) happens here.
    # Static python loop -> static leading-axis scratch stores.
    for t in range(T):
        xt = x_ref[t].astype(jnp.float32) * m_ref[t].astype(jnp.float32)
        gi_ref[t] = jnp.dot(wih, xt, preferred_element_type=jnp.float32) + bgi

    # ---- Phase 2: sequential recurrence.  Weights stay VMEM/vreg-resident;
    # the hidden state (H, BB) is carried in vregs across the unrolled loop.
    # Gate splits are sublane slices (multiples of 8) -> no lane shuffles.
    h = h0_ref[...].astype(jnp.float32)
    for t in range(T):
        gi = gi_ref[t]                                              # (3H, BB)
        gh = jnp.dot(whh, h, preferred_element_type=jnp.float32)    # (3H, BB)
        r = jax.nn.sigmoid(gi[0:H] + gh[0:H])
        z = jax.nn.sigmoid(gi[H:2 * H] + gh[H:2 * H])
        n = jnp.tanh(gi[2 * H:] + r * (gh[2 * H:] + bhn))
        h = (1.0 - z) * n + z * h                                   # unmasked carry
        out_ref[t] = h.astype(out_ref.dtype)                        # lane-dense store

    # ---- Output masking: one wide vectorized pass instead of per-step work
    # on the serial chain.
    out_ref[...] = (out_ref[...].astype(jnp.float32)
                    * m_ref[...].astype(jnp.float32)).astype(out_ref.dtype)


def prepare_params(w_ih, w_hh, b_ih, b_hh):
    """One-time (model-load) weight prep: bias folding (no transposes needed).

    w_ih: (3H, I), w_hh: (3H, H), b_ih/b_hh: (3H,)  -- PyTorch GRUCell layout.
    """
    H = w_hh.shape[1]
    # Fold b_hh's r/z parts into the input-side bias; b_hn must stay separate
    # because it sits inside the r-scaled term of the n gate.
    b_gi = (b_ih + jnp.concatenate(
        [b_hh[:2 * H], jnp.zeros((H,), b_hh.dtype)])).reshape(3 * H, 1)
    b_hn = b_hh[2 * H:].reshape(H, 1)
    return jnp.asarray(w_ih), jnp.asarray(w_hh), b_gi, b_hn


def _gru_decode(x_tib, m_t1b, h0_hb, params, *, block_b=BLOCK_B):
    """One pallas_call for the full (T-step, B-document) masked decode.

    x_tib: (T, I, B), m_t1b: (T, 1, B), h0_hb: (H, B) -> (T, H, B).
    """
    T, I, B = x_tib.shape
    H = h0_hb.shape[0]
    BB = block_b if (B % block_b == 0) else B   # lane width per block
    nb = B // BB
    w_ih, w_hh, b_gi, b_hn = params
    # VMEM per block ~ x(256KB, dbl-buf) + gi scratch(384KB) + out(128KB,
    # dbl-buf) + weights: well under even v7x's 64MiB; no vmem_limit needed.
    return pl.pallas_call(
        gru_seq_kernel,
        out_shape=jax.ShapeDtypeStruct((T, H, B), x_tib.dtype),
        grid_spec=pltpu.PrefetchScalarGridSpec(
            num_scalar_prefetch=0,
            grid=(nb,),
            in_specs=[
                pl.BlockSpec((T, I, BB), lambda b: (0, 0, b)),     # x sequence
                pl.BlockSpec((T, 1, BB), lambda b: (0, 0, b)),     # masks
                pl.BlockSpec((H, BB), lambda b: (0, b)),           # h0
                pl.BlockSpec((3 * H, I), lambda b: (0, 0)),        # W_ih
                pl.BlockSpec((3 * H, H), lambda b: (0, 0)),        # W_hh
                pl.BlockSpec((3 * H, 1), lambda b: (0, 0)),        # folded bias
                pl.BlockSpec((H, 1), lambda b: (0, 0)),            # b_hn
            ],
            out_specs=pl.BlockSpec((T, H, BB), lambda b: (0, 0, b)),
            scratch_shapes=[pltpu.VMEM((T, 3 * H, BB), jnp.float32)],
        ),
        compiler_params=pltpu.CompilerParams(
            # batch-block axis is independent -> shards across v7x's 2 TCs
            dimension_semantics=("parallel",),
        ),
    )(x_tib, m_t1b, h0_hb, w_ih, w_hh, b_gi, b_hn)


def decoder_forward(in_, h_state, params, d_idx=None):
    """Decoder.forward: one GRUCell step (d_idx is unused, as in the module).

    Prefer decoder_run_batch for real decoding: this path pays a full kernel
    launch + weight DMA per step.
    """
    x_tib = jnp.transpose(in_)[None]                      # (1, I, B)
    m_t1b = jnp.ones((1, 1, in_.shape[0]), in_.dtype)
    h0_hb = jnp.transpose(h_state)                        # (H, B)
    out = _gru_decode(x_tib, m_t1b, h0_hb, params)        # (1, H, B)
    return jnp.transpose(out[0])                          # (B, H)


def decoder_run_batch(inputs, init_states, masks, params):
    """Decoder.run_batch: masked sequential decode of a batch of documents.

    inputs      : (B, T, 2*hidden)
    init_states : (B, hidden)
    masks       : (B, T)
    returns     : (B, T, hidden)   masked hidden state after every step
    """
    x_tib = jnp.transpose(inputs, (1, 2, 0))                        # (T, I, B)
    m_t1b = jnp.transpose(masks).astype(inputs.dtype)[:, None, :]   # (T, 1, B)
    h0_hb = jnp.transpose(init_states)                              # (H, B)
    out_thb = _gru_decode(x_tib, m_t1b, h0_hb, params)              # (T, H, B)
    return jnp.transpose(out_thb, (2, 0, 1))                        # (B, T, H)


# ----------------------------- pure-JAX references ---------------------------
def gru_cell_ref(x, h, w_ih, w_hh, b_ih, b_hh):
    """PyTorch nn.GRUCell semantics."""
    gi = x @ w_ih.T + b_ih
    gh = h @ w_hh.T + b_hh
    H = h.shape[-1]
    i_r, i_z, i_n = gi[:, :H], gi[:, H:2 * H], gi[:, 2 * H:]
    h_r, h_z, h_n = gh[:, :H], gh[:, H:2 * H], gh[:, 2 * H:]
    r = jax.nn.sigmoid(i_r + h_r)
    z = jax.nn.sigmoid(i_z + h_z)
    n = jnp.tanh(i_n + r * h_n)
    return (1.0 - z) * n + z * h


def run_batch_ref(inputs, init_states, masks, w_ih, w_hh, b_ih, b_hh):
    x = inputs * masks[..., None]

    def step(h, xt):
        h = gru_cell_ref(xt, h, w_ih, w_hh, b_ih, b_hh)
        return h, h

    _, outs = jax.lax.scan(step, init_states, jnp.swapaxes(x, 0, 1))
    return jnp.swapaxes(outs, 0, 1) * masks[..., None]


if __name__ == "__main__":
    key = jax.random.PRNGKey(0)
    (k_wih, k_whh, k_bih, k_bhh,
     k_x, k_h, k_seq, k_h0, k_len) = jax.random.split(key, 9)

    # PyTorch GRUCell init range: U(-1/sqrt(H), 1/sqrt(H)).
    bound = 1.0 / (HIDDEN_SIZE ** 0.5)
    w_ih = jax.random.uniform(k_wih, (3 * HIDDEN_SIZE, INPUT_SIZE),
                              minval=-bound, maxval=bound, dtype=jnp.float32)
    w_hh = jax.random.uniform(k_whh, (3 * HIDDEN_SIZE, HIDDEN_SIZE),
                              minval=-bound, maxval=bound, dtype=jnp.float32)
    b_ih = jax.random.uniform(k_bih, (3 * HIDDEN_SIZE,),
                              minval=-bound, maxval=bound, dtype=jnp.float32)
    b_hh = jax.random.uniform(k_bhh, (3 * HIDDEN_SIZE,),
                              minval=-bound, maxval=bound, dtype=jnp.float32)

    params = prepare_params(w_ih, w_hh, b_ih, b_hh)   # hoisted, done once

    # --- Decoder.forward: single GRUCell step --------------------------------
    x_step = jax.random.normal(k_x, (BATCH, INPUT_SIZE), dtype=jnp.float32)
    h0 = jax.random.normal(k_h, (BATCH, HIDDEN_SIZE), dtype=jnp.float32)
    h_new = jax.block_until_ready(decoder_forward(x_step, h0, params))
    h_ref = gru_cell_ref(x_step, h0, w_ih, w_hh, b_ih, b_hh)
    assert jnp.allclose(h_new, h_ref, atol=1e-5, rtol=1e-5), "forward mismatch"

    # --- Decoder.run_batch: masked sequential decode of BATCH documents ------
    inputs = jax.random.normal(k_seq, (BATCH, SEQ_LEN, INPUT_SIZE),
                               dtype=jnp.float32)
    init_states = jax.random.normal(k_h0, (BATCH, HIDDEN_SIZE),
                                    dtype=jnp.float32)
    lengths = jax.random.randint(k_len, (BATCH,), 1, SEQ_LEN + 1)
    masks = (jnp.arange(SEQ_LEN)[None, :] < lengths[:, None]).astype(jnp.float32)

    outs = jax.block_until_ready(
        decoder_run_batch(inputs, init_states, masks, params))
    outs_ref = run_batch_ref(inputs, init_states, masks, w_ih, w_hh, b_ih, b_hh)
    assert jnp.allclose(outs, outs_ref, atol=1e-5, rtol=1e-5), "run_batch mismatch"

    # TODO(synk): decode_one's python-thread-per-document orchestration and the
    # unused d_idx argument have no kernel equivalent; they are replaced by the
    # lane-batched documents of this kernel.

    print("KERNEL_OK")
</pallas_src>

<mosaic_0001>
module attributes {stable_mosaic.version = 11 : i64} {
  func.func @gru_seq_kernel(%arg0: i32, %arg1: memref<1x64x128xf32, #tpu.memory_space<vmem>>, %arg2: memref<1x1x128xf32, #tpu.memory_space<vmem>>, %arg3: memref<32x128xf32, #tpu.memory_space<vmem>>, %arg4: memref<96x64xf32, #tpu.memory_space<vmem>>, %arg5: memref<96x32xf32, #tpu.memory_space<vmem>>, %arg6: memref<96x1xf32, #tpu.memory_space<vmem>>, %arg7: memref<32x1xf32, #tpu.memory_space<vmem>>, %arg8: memref<1x32x128xf32, #tpu.memory_space<vmem>>, %arg9: memref<1x96x128xf32, #tpu.memory_space<vmem>>) attributes {dimension_semantics = [#tpu.dimension_semantics<parallel>], iteration_bounds = array<i64: 2>, scalar_prefetch = 0 : i64, scratch_operands = 1 : i64, tpu.core_type = #tpu.core_type<tc>, window_params = [{transform_indices = @transform_0, window_bounds = array<i64: 1, 64, 128>}, {transform_indices = @transform_1, window_bounds = array<i64: 1, 1, 128>}, {transform_indices = @transform_2, window_bounds = array<i64: 32, 128>}, {pipeline_mode = #tpu.pipeline_mode<synchronous>, transform_indices = @transform_3, window_bounds = array<i64: 96, 64>}, {pipeline_mode = #tpu.pipeline_mode<synchronous>, transform_indices = @transform_4, window_bounds = array<i64: 96, 32>}, {pipeline_mode = #tpu.pipeline_mode<synchronous>, transform_indices = @transform_5, window_bounds = array<i64: 96, 1>}, {pipeline_mode = #tpu.pipeline_mode<synchronous>, transform_indices = @transform_6, window_bounds = array<i64: 32, 1>}, {transform_indices = @transform_7, window_bounds = array<i64: 1, 32, 128>}]} {
    %c0 = arith.constant 0 : index
    %c0_0 = arith.constant 0 : index
    %0 = vector.load %arg4[%c0, %c0_0] : memref<96x64xf32, #tpu.memory_space<vmem>>, vector<96x64xf32>
    %c0_1 = arith.constant 0 : index
    %c0_2 = arith.constant 0 : index
    %1 = vector.load %arg5[%c0_1, %c0_2] : memref<96x32xf32, #tpu.memory_space<vmem>>, vector<96x32xf32>
    %c0_3 = arith.constant 0 : index
    %c0_4 = arith.constant 0 : index
    %2 = vector.load %arg6[%c0_3, %c0_4] : memref<96x1xf32, #tpu.memory_space<vmem>>, vector<96x1xf32>
    %3 = vector.shape_cast %2 : vector<96x1xf32> to vector<96x1xf32>
    %4 = vector.broadcast %3 : vector<96x1xf32> to vector<96x128xf32>
    %c0_5 = arith.constant 0 : index
    %c0_6 = arith.constant 0 : index
    %5 = vector.load %arg7[%c0_5, %c0_6] : memref<32x1xf32, #tpu.memory_space<vmem>>, vector<32x1xf32>
    %6 = vector.shape_cast %5 : vector<32x1xf32> to vector<32x1xf32>
    %7 = vector.broadcast %6 : vector<32x1xf32> to vector<32x128xf32>
    %c0_7 = arith.constant 0 : index
    %c0_8 = arith.constant 0 : index
    %c0_9 = arith.constant 0 : index
    %8 = vector.load %arg1[%c0_7, %c0_8, %c0_9] : memref<1x64x128xf32, #tpu.memory_space<vmem>>, vector<1x64x128xf32>
    %9 = vector.shape_cast %8 : vector<1x64x128xf32> to vector<64x128xf32>
    %c0_10 = arith.constant 0 : index
    %c0_11 = arith.constant 0 : index
    %c0_12 = arith.constant 0 : index
    %10 = vector.load %arg2[%c0_10, %c0_11, %c0_12] : memref<1x1x128xf32, #tpu.memory_space<vmem>>, vector<1x1x128xf32>
    %11 = vector.shape_cast %10 : vector<1x1x128xf32> to vector<1x128xf32>
    %12 = vector.broadcast %11 : vector<1x128xf32> to vector<64x128xf32>
    %13 = arith.mulf %9, %12 : vector<64x128xf32>
    %cst = arith.constant dense<0.000000e+00> : vector<96x128xf32>
    %14 = tpu.matmul %0, %13, %cst {dimension_numbers = #tpu.dot_dimension_numbers<[1], [0], [0], [1], [0, 0, 1, 1], [], []>} : vector<96x64xf32>, vector<64x128xf32>, vector<96x128xf32> -> vector<96x128xf32>
    %15 = arith.addf %14, %4 : vector<96x128xf32>
    %c0_13 = arith.constant 0 : index
    %c0_14 = arith.constant 0 : index
    %c0_15 = arith.constant 0 : index
    %16 = vector.load %arg9[%c0_13, %c0_14, %c0_15] : memref<1x96x128xf32, #tpu.memory_space<vmem>>, vector<1x96x128xf32>
    %17 = vector.shape_cast %16 : vector<1x96x128xf32> to vector<96x128xf32>
    %18 = vector.shape_cast %15 : vector<96x128xf32> to vector<1x96x128xf32>
    tpu.vector_store %arg9[%c0_13, %c0_14, %c0_15], %18 {strides = array<i32>} : memref<1x96x128xf32, #tpu.memory_space<vmem>>, vector<1x96x128xf32>,
    %c0_16 = arith.constant 0 : index
    %c0_17 = arith.constant 0 : index
    %19 = vector.load %arg3[%c0_16, %c0_17] : memref<32x128xf32, #tpu.memory_space<vmem>>, vector<32x128xf32>
    %c0_18 = arith.constant 0 : index
    %c0_19 = arith.constant 0 : index
    %c0_20 = arith.constant 0 : index
    %20 = vector.load %arg9[%c0_18, %c0_19, %c0_20] : memref<1x96x128xf32, #tpu.memory_space<vmem>>, vector<1x96x128xf32>
    %21 = vector.shape_cast %20 : vector<1x96x128xf32> to vector<96x128xf32>
    %cst_21 = arith.constant dense<0.000000e+00> : vector<96x128xf32>
    %22 = tpu.matmul %1, %19, %cst_21 {dimension_numbers = #tpu.dot_dimension_numbers<[1], [0], [0], [1], [0, 0, 1, 1], [], []>} : vector<96x32xf32>, vector<32x128xf32>, vector<96x128xf32> -> vector<96x128xf32>
    %23 = vector.extract_strided_slice %21 {offsets = [0, 0], sizes = [32, 128], strides = [1, 1]} : vector<96x128xf32> to vector<32x128xf32>
    %24 = vector.extract_strided_slice %22 {offsets = [0, 0], sizes = [32, 128], strides = [1, 1]} : vector<96x128xf32> to vector<32x128xf32>
    %25 = arith.addf %23, %24 : vector<32x128xf32>
    %26 = arith.negf %25 : vector<32x128xf32>
    %27 = math.exp %26 : vector<32x128xf32>
    %cst_22 = arith.constant 1.000000e+00 : f32
    %28 = vector.broadcast %cst_22 : f32 to vector<32x128xf32>
    %29 = arith.addf %28, %27 : vector<32x128xf32>
    %30 = arith.divf %28, %29 : vector<32x128xf32>
    %31 = vector.extract_strided_slice %21 {offsets = [32, 0], sizes = [32, 128], strides = [1, 1]} : vector<96x128xf32> to vector<32x128xf32>
    %32 = vector.extract_strided_slice %22 {offsets = [32, 0], sizes = [32, 128], strides = [1, 1]} : vector<96x128xf32> to vector<32x128xf32>
    %33 = arith.addf %31, %32 : vector<32x128xf32>
    %34 = arith.negf %33 : vector<32x128xf32>
    %35 = math.exp %34 : vector<32x128xf32>
    %cst_23 = arith.constant 1.000000e+00 : f32
    %36 = vector.broadcast %cst_23 : f32 to vector<32x128xf32>
    %37 = arith.addf %36, %35 : vector<32x128xf32>
    %38 = arith.divf %36, %37 : vector<32x128xf32>
    %39 = vector.extract_strided_slice %21 {offsets = [64, 0], sizes = [32, 128], strides = [1, 1]} : vector<96x128xf32> to vector<32x128xf32>
    %40 = vector.extract_strided_slice %22 {offsets = [64, 0], sizes = [32, 128], strides = [1, 1]} : vector<96x128xf32> to vector<32x128xf32>
    %41 = arith.addf %40, %7 : vector<32x128xf32>
    %42 = arith.mulf %30, %41 : vector<32x128xf32>
    %43 = arith.addf %39, %42 : vector<32x128xf32>
    %44 = math.tanh %43 : vector<32x128xf32>
    %cst_24 = arith.constant 1.000000e+00 : f32
    %45 = vector.broadcast %cst_24 : f32 to vector<32x128xf32>
    %46 = arith.subf %45, %38 : vector<32x128xf32>
    %47 = arith.mulf %46, %44 : vector<32x128xf32>
    %48 = arith.mulf %38, %19 : vector<32x128xf32>
    %49 = arith.addf %47, %48 : vector<32x128xf32>
    %c0_25 = arith.constant 0 : index
    %c0_26 = arith.constant 0 : index
    %c0_27 = arith.constant 0 : index
    %50 = vector.load %arg8[%c0_25, %c0_26, %c0_27] : memref<1x32x128xf32, #tpu.memory_space<vmem>>, vector<1x32x128xf32>
    %51 = vector.shape_cast %50 : vector<1x32x128xf32> to vector<32x128xf32>
    %52 = vector.shape_cast %49 : vector<32x128xf32> to vector<1x32x128xf32>
    tpu.vector_store %arg8[%c0_25, %c0_26, %c0_27], %52 {strides = array<i32>} : memref<1x32x128xf32, #tpu.memory_space<vmem>>, vector<1x32x128xf32>,
    %c0_28 = arith.constant 0 : index
    %c0_29 = arith.constant 0 : index
    %c0_30 = arith.constant 0 : index
    %53 = vector.load %arg8[%c0_28, %c0_29, %c0_30] : memref<1x32x128xf32, #tpu.memory_space<vmem>>, vector<1x32x128xf32>
    %c0_31 = arith.constant 0 : index
    %c0_32 = arith.constant 0 : index
    %c0_33 = arith.constant 0 : index
    %54 = vector.load %arg2[%c0_31, %c0_32, %c0_33] : memref<1x1x128xf32, #tpu.memory_space<vmem>>, vector<1x1x128xf32>
    %55 = vector.broadcast %54 : vector<1x1x128xf32> to vector<1x32x128xf32>
    %56 = arith.mulf %53, %55 : vector<1x32x128xf32>
    %c0_34 = arith.constant 0 : index
    %c0_35 = arith.constant 0 : index
    %c0_36 = arith.constant 0 : index
    %57 = vector.load %arg8[%c0_34, %c0_35, %c0_36] : memref<1x32x128xf32, #tpu.memory_space<vmem>>, vector<1x32x128xf32>
    tpu.vector_store %arg8[%c0_34, %c0_35, %c0_36], %56 {strides = array<i32>} : memref<1x32x128xf32, #tpu.memory_space<vmem>>, vector<1x32x128xf32>,
    return
  }
  func.func @transform_0(%arg0: i32) -> (i32, i32, i32) {
    %c0_i32 = arith.constant 0 : i32
    %c0_i32_0 = arith.constant 0 : i32
    %c0_i32_1 = arith.constant 0 : i32
    return %c0_i32, %c0_i32_0, %arg0 : i32, i32, i32
  }
  func.func @transform_1(%arg0: i32) -> (i32, i32, i32) {
    %c0_i32 = arith.constant 0 : i32
    %c0_i32_0 = arith.constant 0 : i32
    %c0_i32_1 = arith.constant 0 : i32
    return %c0_i32, %c0_i32_0, %arg0 : i32, i32, i32
  }
  func.func @transform_2(%arg0: i32) -> (i32, i32) {
    %c0_i32 = arith.constant 0 : i32
    %c0_i32_0 = arith.constant 0 : i32
    return %c0_i32, %arg0 : i32, i32
  }
  func.func @transform_3(%arg0: i32) -> (i32, i32) {
    %c0_i32 = arith.constant 0 : i32
    %c0_i32_0 = arith.constant 0 : i32
    %c0_i32_1 = arith.constant 0 : i32
    return %c0_i32, %c0_i32_0 : i32, i32
  }
  func.func @transform_4(%arg0: i32) -> (i32, i32) {
    %c0_i32 = arith.constant 0 : i32
    %c0_i32_0 = arith.constant 0 : i32
    %c0_i32_1 = arith.constant 0 : i32
    return %c0_i32, %c0_i32_0 : i32, i32
  }
  func.func @transform_5(%arg0: i32) -> (i32, i32) {
    %c0_i32 = arith.constant 0 : i32
    %c0_i32_0 = arith.constant 0 : i32
    %c0_i32_1 = arith.constant 0 : i32
    return %c0_i32, %c0_i32_0 : i32, i32
  }
  func.func @transform_6(%arg0: i32) -> (i32, i32) {
    %c0_i32 = arith.constant 0 : i32
    %c0_i32_0 = arith.constant 0 : i32
    %c0_i32_1 = arith.constant 0 : i32
    return %c0_i32, %c0_i32_0 : i32, i32
  }
  func.func @transform_7(%arg0: i32) -> (i32, i32, i32) {
    %c0_i32 = arith.constant 0 : i32
    %c0_i32_0 = arith.constant 0 : i32
    %c0_i32_1 = arith.constant 0 : i32
    return %c0_i32, %c0_i32_0, %arg0 : i32, i32, i32
  }
}

</mosaic_0001>

<bundles_post_ra>
// kernel: tpu_custom_call.1
= control target key start
LH: loop header
LB: loop body
LE: loop exit
PB: predicated region body
PF: predicated region fallthrough
CT: control target
= control target key end

     0   :  { %12 = vsyncpa [#allocation6], 0  ;;  %s1834_s0 = inlined_call_operand.vmem [shape: f32[1,64,256], index: 0, kind: input, shape index: {}]   ;;  %s1835_s1 = inlined_call_operand.vmem [shape: f32[1,1,256], index: 1, kind: input, shape index: {}]   ;;  %s1836_s2 = inlined_call_operand.vmem [shape: f32[32,256], index: 2, kind: input, shape index: {}]   ;;  %s1837_s3 = inlined_call_operand.vmem [shape: f32[96,64], index: 3, kind: input, shape index: {}]   ;;  %s1838_s4 = inlined_call_operand.vmem [shape: f32[96,32], index: 4, kind: input, shape index: {}]   ;;  %s1839_s5 = inlined_call_operand.vmem [shape: f32[96,1], index: 5, kind: input, shape index: {}]   ;;  %s1840_s6 = inlined_call_operand.vmem [shape: f32[32,1], index: 6, kind: input, shape index: {}]   ;;  %s1841_s7 = inlined_call_operand.hbm [shape: f32[1,32,256], index: 7, kind: output, shape index: {}]  }
   0x1   :  { %14 = vsyncpa [#allocation6 + $0x1], 0  ;;  %s1512_s24 = smov 0   ;;  %s1514_s25 = smov 0  }
   0x2   :  { %s1516_s26 = smov 0   ;;  %s1518_s27 = smov 0  }
   0x3 LB: > { %s1533_s28 = sadd.s32 4294967295, %s1465_s27   ;;  %s1133_s29 = sadd.s32 4294967294, %s1465_s27   ;;  %s1465_s27 = sphi %s1518_s27, %s1848_s27   ;;  %s1461_s26 = sphi %s1516_s26, %s1847_s26   ;;  %s1457_s25 = sphi %s1514_s25, %s1846_s25   ;;  %s1453_s24 = sphi %s1512_s24, %s1845_s24  }
   0x4   : > { %s1537_s30 = sadd.s32 1, %s1465_s27   ;;  %s27_s8 = sadd.s32 1, %s1461_s26 }
   0x5   : > { %s24_s9 = ssub.s32 %s1465_s27, %s1537_s30  ;;  %p34_p0 = scmp.ne.s32.totalorder %s1461_s26, %s1457_s25 }
   0x6   : > { %p25_p1 = scmp.eq.s32.totalorder %s24_s9, 0  ;;  %p35_p2 = scmp.eq.s32.totalorder %s1465_s27, 0 }
   0x7   : > { %p200_p3 = scmp.eq.s32.totalorder %s1533_s28, 1  ;;  %p205_p4 = scmp.ne.s32.totalorder %s1457_s25, %s1453_s24 }
   0x8   : > { %s1549_s10 = scalar_select %p25_p1, %s1461_s26, %s27_s8  }
   0x9   : > { %p1551_p5 = por %p35_p2, %p34_p0  ;;  %p1555_p6 = por %p200_p3, %p34_p0 }
   0xa   : > { %p206_p7 = scmp.eq.s32.totalorder %s1133_s29, 1  ;;  %p1135_p9 = scmp.ge.s32.totalorder %s1465_s27, 2 }
   0xc   : > { %p1559_p8 = por %p206_p7, %p205_p4  ;;  %234 = sbr.rel (%p1135_p9) target bundleno = 34 (0x22), region = 32 }
  0x13   : > { %237 = sbr.rel (!%p1551_p5) target bundleno = 27 (0x1b), region = 36  ;;  %s239_s14 = sand.u32 (%p1551_p5), 1, %s1461_s26  }
  0x14   : > { %s1137_s15 = sshll.u32 (%p1551_p5), %s1465_s27, 3  ;;  %s1136_s16 = sshll.u32 (%p1551_p5), %s239_s14, 6 }
  0x15   : > { %s243_s19 = scalar_lea.vmem (%p1551_p5), %s1834_s0, %s1137_s15  ;;  %s241_s20 = scalar_lea.vmem (%p1551_p5), [#allocation3], %s1136_s16 }
  0x16   : > { %v285_v0 = vld [vmem:[%s243_s19] sm:$0xff] (%p1551_p5)  ;;  %v287_v1 = vld [vmem:[%s243_s19 + $0x10] sm:$0xff] (%p1551_p5) }
  0x17   : > { %v289_v2 = vld [vmem:[%s243_s19 + $0x20] sm:$0xff] (%p1551_p5)  ;;  %286 = vst [vmem:[%s241_s20] sm:$0xff] (%p1551_p5), %v285_v0  ;;  %288 = vst [vmem:[%s241_s20 + $0x8] sm:$0xff] (%p1551_p5), %v287_v1  ;;  %v291_v3 = vld [vmem:[%s243_s19 + $0x30] sm:$0xff] (%p1551_p5) }
  0x18   : > { %290 = vst [vmem:[%s241_s20 + $0x10] sm:$0xff] (%p1551_p5), %v289_v2  ;;  %v293_v4 = vld [vmem:[%s243_s19 + $0x40] sm:$0xff] (%p1551_p5)  ;;  %v295_v5 = vld [vmem:[%s243_s19 + $0x50] sm:$0xff] (%p1551_p5)  ;;  %292 = vst [vmem:[%s241_s20 + $0x18] sm:$0xff] (%p1551_p5), %v291_v3 }
  0x19   : > { %294 = vst [vmem:[%s241_s20 + $0x20] sm:$0xff] (%p1551_p5), %v293_v4  ;;  %296 = vst [vmem:[%s241_s20 + $0x28] sm:$0xff] (%p1551_p5), %v295_v5  ;;  %v297_v6 = vld [vmem:[%s243_s19 + $0x60] sm:$0xff] (%p1551_p5)  ;;  %v299_v7 = vld [vmem:[%s243_s19 + $0x70] sm:$0xff] (%p1551_p5) }
  0x1a   : > { %298 = vst [vmem:[%s241_s20 + $0x30] sm:$0xff] %v297_v6  ;;  %300 = vst [vmem:[%s241_s20 + $0x38] sm:$0xff] %v299_v7 }
  0x1b PF: > { %312 = sbr.rel (!%p1551_p5) target bundleno = 34 (0x22), region = 78  ;;  %s314_s21 = sand.u32 (%p1551_p5), 1, %s1461_s26  }
  0x1c   : > { %s1139_s22 = sshll.u32 (%p1551_p5), %s1465_s27, 3  ;;  %s1138_s23 = sshll.u32 (%p1551_p5), %s314_s21, 5 }
  0x1d   : > { %s318_s9 = scalar_lea.vmem (%p1551_p5), %s1836_s2, %s1139_s22  ;;  %s316_s14 = scalar_lea.vmem (%p1551_p5), [#allocation4], %s1138_s23 }
  0x1e   : > { %v352_v8 = vld [vmem:[%s318_s9] sm:$0xff] (%p1551_p5)  ;;  %v354_v9 = vld [vmem:[%s318_s9 + $0x10] sm:$0xff] (%p1551_p5) }
  0x1f   : > { %v356_v10 = vld [vmem:[%s318_s9 + $0x20] sm:$0xff] (%p1551_p5)  ;;  %353 = vst [vmem:[%s316_s14] sm:$0xff] (%p1551_p5), %v352_v8  ;;  %355 = vst [vmem:[%s316_s14 + $0x8] sm:$0xff] (%p1551_p5), %v354_v9  ;;  %v358_v11 = vld [vmem:[%s318_s9 + $0x30] sm:$0xff] (%p1551_p5) }
  0x20   : > { %357 = vst [vmem:[%s316_s14 + $0x10] sm:$0xff] (%p1551_p5), %v356_v10  ;;  %359 = vst [vmem:[%s316_s14 + $0x18] sm:$0xff] (%p1551_p5), %v358_v11 }
  0x22 PF: > { %p1140_p10 = scmp.ge.s32.totalorder %s1465_s27, 1  ;;  %p364_p11 = scmp.lt.s32.totalorder %s1465_s27, 3 }
  0x24   : > { %p365_p12 = pnand %p1140_p10, %p364_p11 }
  0x25   : > { %s1583_s11 = sand.u32 (!%p365_p12), 1, %s1457_s25   ;;  %p416_p13 = scmp.lt.s32.totalorder (!%p365_p12), %s1533_s28, 1  ;;  %v431_v12 = vld [vmem:[%s1838_s4] sm:$0xff] (!%p365_p12)  ;;  %vm752_vm0 = vcmask (!%p365_p12), 261120   ;;  %vm562_vm1 = vcmask (!%p365_p12), 523264   ;;  %v1467_v16 = vmov (!%p365_p12), 0  }
  0x26   : > { %368 = sbr.rel (%p365_p12) target bundleno = 353 (0x161), region = 116  ;;  %s1141_s17 = sshll.u32 (!%p365_p12), %s1583_s11, 6  ;;  %1260 = vmatprep.mubr.msk.f32.mxu0 (!%p365_p12), %vm752_vm0, %v431_v12  ;;  %v419_v13 = vld [vmem:[%s1837_s3] sm:$0xff] (!%p365_p12)  ;;  %1362 = vset.pattern.permute.xlu1 (!%p365_p12), %v1467_v16  ;;  %v432_v36 = vld [vmem:[%s1838_s4 + $0x8] sm:$0xff] (!%p365_p12)  ;;  %v433_v39 = vld [vmem:[%s1838_s4 + $0x10] sm:$0xff] (!%p365_p12) }
  0x27   : > { %s1142_s18 = sshll.u32 (!%p365_p12), %s1583_s11, 5  ;;  %1234 = vmatprep.mubr.msk.f32.mxu1 (!%p365_p12), %vm562_vm1, %v419_v13  ;;  %s373_s23 = scalar_lea.vmem (!%p365_p12), [#allocation3], %s1141_s17  ;;  %1361 = vset.pattern.permute.xlu0 (!%p365_p12), %v1467_v16  ;;  %v445_v40 = vld [vmem:[%s1839_s5 + $0x10] sm:$0xff] (!%p365_p12)  ;;  %v443_v41 = vld [vmem:[%s1839_s5] sm:$0xff] (!%p365_p12)  ;;  %v446_v45 = vld [vmem:[%s1839_s5 + $0x18] sm:$0xff] (!%p365_p12) }
  0x28   : > { %s380_s21 = scalar_lea.vmem (!%p365_p12), [#allocation4], %s1142_s18  ;;  %v539_v18 = vld [vmem:[%s373_s23] sm:$0xff] (!%p365_p12)  ;;  %v540_v21 = vld [vmem:[%s373_s23 + $0x8] sm:$0xff] (!%p365_p12)  ;;  %v541_v23 = vld [vmem:[%s373_s23 + $0x10] sm:$0xff] (!%p365_p12)  ;;  %467 = vperm.xlu1 (!%p365_p12), %1362, %v445_v40   ;;  %457 = vperm.xlu0 (!%p365_p12), %1361, %v443_v41   ;;  %s1179_s19 = sshll.u32 (!%p365_p12), %s1533_s28, 7 }
  0x29   : > { %v1597_v14 = vld [vmem:[%s380_s21] sm:$0xff] (!%p365_p12)  ;;  %v1599_v15 = vld [vmem:[%s380_s21 + $0x8] sm:$0xff] (!%p365_p12)  ;;  %v1607_v19 = vld [vmem:[%s380_s21 + $0x10] sm:$0xff] (!%p365_p12)  ;;  %s415_s20 = scalar_lea.vmem (!%p365_p12), [#allocation5], %s1142_s18  ;;  %s1786_s29 = scalar_lea.hbm (!%p365_p12), %s1841_s7, %s1179_s19 }
  0x2a   : > { %v1294_v17 = vpack.c.bf16 (!%p365_p12), %v1599_v15, %v1597_v14  ;;  %v1609_v20 = vld [vmem:[%s380_s21 + $0x18] sm:$0xff] (!%p365_p12)  ;;  %v543_v26 = vld [vmem:[%s373_s23 + $0x20] sm:$0xff] (!%p365_p12)  ;;  %v544_v27 = vld [vmem:[%s373_s23 + $0x28] sm:$0xff] (!%p365_p12)  ;;  %s1038_s21 = sshll.u32 (!%p365_p12), %s415_s20, 4  ;;  %s1468_s8 = smov (!%p365_p12), [#allocation5]   ;;  %s1789_s21 = int_to_ptr.vmem [resolvable:$true] %s1038_s21 }
  0x2b   : > { %v1298_v22 = vpack.c.bf16 (!%p365_p12), %v1609_v20, %v1607_v19  ;;  %v542_v24 = vld [vmem:[%s373_s23 + $0x18] sm:$0xff] (!%p365_p12)  ;;  %v545_v37 = vld [vmem:[%s373_s23 + $0x30] sm:$0xff] (!%p365_p12)  ;;  %v435_v47 = vld [vmem:[%s1838_s4 + $0x20] sm:$0xff] (!%p365_p12)  ;;  %s1403_s18 = scalar_lea.vmem (!%p365_p12), %s1789_s21, 512 }
  0x2c   : > { %1295 = vmatprep.subr.bf16.mxu0 (!%p365_p12), %v1294_v17  ;;  %v546_v38 = vld [vmem:[%s373_s23 + $0x38] sm:$0xff] (!%p365_p12)  ;;  %v444_v48 = vld [vmem:[%s1839_s5 + $0x8] sm:$0xff] (!%p365_p12)  ;;  %472 = vperm.xlu1 (!%p365_p12), %1362, %v446_v45   ;;  %v437_v52 = vld [vmem:[%s1838_s4 + $0x30] sm:$0xff] (!%p365_p12)  ;;  %p1404_p0 = scmp.ne.s32.totalorder (!%p365_p12), %s1789_s21, %s1403_s18 }
  0x2d   : > { %s417_s22 = scalar_select %p416_p13, %s1533_s28, 1  ;;  %1297 = vmatpush3.bf16.msra.mxu0 %v1294_v17  ;;  %v434_v46 = vld [vmem:[%s1838_s4 + $0x18] sm:$0xff]  ;;  %v448_v50 = vld [vmem:[%s1839_s5 + $0x28] sm:$0xff]  ;;  %462 = vperm.xlu0 %1361, %v444_v48   ;;  %v447_v53 = vld [vmem:[%s1839_s5 + $0x20] sm:$0xff] }
  0x2e   : > { %1299 = vmatprep.subr.bf16.mxu0 %v1298_v22  ;;  %v436_v51 = vld [vmem:[%s1838_s4 + $0x28] sm:$0xff]  ;;  %v450_v54 = vld [vmem:[%s1839_s5 + $0x38] sm:$0xff]  ;;  %v439_v56 = vld [vmem:[%s1838_s4 + $0x40] sm:$0xff]  ;;  %s1026_s28 = scalar_lea.sflag [#allocation6], %s1583_s11  ;;  %p1405_p1 = pnand %p1404_p0, %p1555_p6 }
  0x2f   : > { %s418_s9 = scalar_lea.vmem %s1835_s1, %s417_s22  ;;  %v438_v55 = vld [vmem:[%s1838_s4 + $0x38] sm:$0xff]  ;;  %v449_v57 = vld [vmem:[%s1839_s5 + $0x30] sm:$0xff]  ;;  %v420_v58 = vld [vmem:[%s1837_s3 + $0x8] sm:$0xff] }
  0x30   : > { %v1616_v25 = vld [vmem:[%s418_s9] ss:$0 sm:$0xff]  ;;  %482 = vperm.xlu1 %1362, %v448_v50   ;;  %v421_v59 = vld [vmem:[%s1837_s3 + $0x10] sm:$0xff]  ;;  %v516_v60 = vld [vmem:[%s1840_s6 + $0x8] sm:$0xff]  ;;  %p1406_p2 = pneg %p1405_p1  ;;  %s1407_s9 = sshll.u32 %s1468_s8, 4  ;;  %s1408_s9 = int_to_ptr.vmem [resolvable:$false] %s1407_s9 }
  0x31   : > { %v554_v28 = vmul.f32 %v1616_v25, %v539_v18  ;;  %v555_v29 = vmul.f32 %v1616_v25, %v540_v21  ;;  %v556_v30 = vmul.f32 %v1616_v25, %v541_v23  ;;  %v557_v31 = vmul.f32 %v1616_v25, %v542_v24  ;;  %1301 = vmatpush3.bf16.msra.mxu0 %v1298_v22  ;;  %v440_v61 = vld [vmem:[%s1838_s4 + $0x48] sm:$0xff]  ;;  %v441_v62 = vld [vmem:[%s1838_s4 + $0x50] sm:$0xff]  ;;  %v515_v63 = vld [vmem:[%s1840_s6] sm:$0xff]  ;;  %s1409_s14 = scalar_lea.vmem %s1408_s9, 1024  ;;  %p1410_p3 = scmp.lt.s32.totalorder %s1789_s21, %s1408_s9 }
  0x32   : > { %v558_v34 = vmul.f32 %v1616_v25, %v543_v26  ;;  %v559_v35 = vmul.f32 %v1616_v25, %v544_v27  ;;  %v560_v43 = vmul.f32 %v1616_v25, %v545_v37  ;;  %v561_v44 = vmul.f32 %v1616_v25, %v546_v38  ;;  %477 = vperm.xlu0 %1361, %v447_v53   ;;  %v422_v0 = vld [vmem:[%s1837_s3 + $0x18] sm:$0xff]  ;;  %v423_v1 = vld [vmem:[%s1837_s3 + $0x20] sm:$0xff]  ;;  %v517_v4 = vld [vmem:[%s1840_s6 + $0x10] sm:$0xff]  ;;  %p1411_p4 = scmp.lt.s32.totalorder %s1409_s14, %s1403_s18 }
  0x33   : > { %v1278_v32 = vpack.c.bf16 %v555_v29, %v554_v28  ;;  %v1282_v33 = vpack.c.bf16 %v557_v31, %v556_v30  ;;  %v518_v2 = vld [vmem:[%s1840_s6 + $0x18] sm:$0xff]  ;;  %v424_v5 = vld [vmem:[%s1837_s3 + $0x28] sm:$0xff]  ;;  %v425_v6 = vld [vmem:[%s1837_s3 + $0x30] sm:$0xff] }
  0x34   : > { %1261 = vmatmul.mubr.msk.f32.vlgmr.msra.gmra.mrb[0].mxu0 %vm752_vm0, %v432_v36  ;;  %v1286_v42 = vpack.c.bf16 %v559_v35, %v558_v34  ;;  %v1290_v49 = vpack.c.bf16 %v561_v44, %v560_v43  ;;  %492 = vperm.xlu1 %1362, %v450_v54   ;;  %v442_v3 = vld [vmem:[%s1838_s4 + $0x58] sm:$0xff]  ;;  %v452_v7 = vld [vmem:[%s1839_s5 + $0x48] sm:$0xff]  ;;  %v451_v8 = vld [vmem:[%s1839_s5 + $0x40] sm:$0xff]  ;;  %p1412_p5 = por %p1411_p4, %p1410_p3 }
  0x35   : > { %1279 = vmatprep.subr.bf16.mxu1 %v1278_v32  ;;  %1263 = vmatprep.mubr.msk.f32.mxu0 %vm752_vm0, %v433_v39  ;;  %v426_v9 = vld [vmem:[%s1837_s3 + $0x38] sm:$0xff]  ;;  %v427_v10 = vld [vmem:[%s1837_s3 + $0x40] sm:$0xff]  ;;  %v453_v12 = vld [vmem:[%s1839_s5 + $0x50] sm:$0xff] }
  0x36   : > { %1281 = vmatpush3.bf16.msra.mxu1 %v1278_v32  ;;  %487 = vperm.xlu0 %1361, %v449_v57   ;;  %v454_v11 = vld [vmem:[%s1839_s5 + $0x58] sm:$0xff]  ;;  %v428_v13 = vld [vmem:[%s1837_s3 + $0x48] sm:$0xff]  ;;  %v429_v16 = vld [vmem:[%s1837_s3 + $0x50] sm:$0xff]  ;;  %p1413_p7 = pnand %p1412_p5, %p1406_p2 }
  0x37   : > { %1283 = vmatprep.subr.bf16.mxu1 %v1282_v33  ;;  %v430_v17 = vld [vmem:[%s1837_s3 + $0x58] sm:$0xff] }
  0x38   : > { %1264 = vmatmul.mubr.msk.f32.gmra.mrb[2].mxu0 %vm752_vm0, %v434_v46  ;;  %526 = vperm.xlu1 %1362, %v516_v60  }
  0x39   : > { %1266 = vmatprep.mubr.msk.f32.mxu0 %vm752_vm0, %v435_v47 }
  0x3a   : > { %1285 = vmatpush3.bf16.msra.mxu1 %v1282_v33  ;;  %521 = vperm.xlu0 %1361, %v515_v63  }
  0x3b   : > { %1287 = vmatprep.subr.bf16.mxu1 %v1286_v42 }
  0x3c   : > { %1267 = vmatmul.mubr.msk.f32.gmra.mrb[4].mxu0 %vm752_vm0, %v436_v51  ;;  %536 = vperm.xlu1 %1362, %v518_v2  }
  0x3d   : > { %1269 = vmatprep.mubr.msk.f32.mxu0 %vm752_vm0, %v437_v52 }
  0x3e   : > { %1289 = vmatpush3.bf16.msra.mxu1 %v1286_v42  ;;  %531 = vperm.xlu0 %1361, %v517_v4  }
  0x3f   : > { %1291 = vmatprep.subr.bf16.mxu1 %v1290_v49 }
  0x40   : > { %1270 = vmatmul.mubr.msk.f32.gmra.mrb[6].mxu0 %vm752_vm0, %v438_v55  ;;  %502 = vperm.xlu1 %1362, %v452_v7  }
  0x41   : > { %1272 = vmatprep.mubr.msk.f32.mxu0 %vm752_vm0, %v439_v56 }
  0x42   : > { %1293 = vmatpush3.bf16.msra.mxu1 %v1290_v49  ;;  %497 = vperm.xlu0 %1361, %v451_v8  }
  0x44   : > { %1273 = vmatmul.mubr.msk.f32.gmra.mrb[8].mxu0 %vm752_vm0, %v440_v61  ;;  %512 = vperm.xlu1 %1362, %v454_v11  }
  0x45   : > { %1235 = vmatmul.mubr.msk.f32.vlgmr.msra.gmra.mrb[0].mxu1 %vm562_vm1, %v420_v58  ;;  %1275 = vmatprep.mubr.msk.f32.mxu0 %vm752_vm0, %v441_v62 }
  0x46   : > { %1237 = vmatprep.mubr.msk.f32.mxu1 %vm562_vm1, %v421_v59  ;;  %507 = vperm.xlu0 %1361, %v453_v12  }
  0x48   : > { %1276 = vmatmul.mubr.msk.f32.gmra.mrb[10].mxu0 %vm752_vm0, %v442_v3 }
  0x49   : > { %1238 = vmatmul.mubr.msk.f32.gmra.mrb[2].mxu1 %vm562_vm1, %v422_v0 }
  0x4a   : > { %1240 = vmatprep.mubr.msk.f32.mxu1 %vm562_vm1, %v423_v1 }
  0x4d   : > { %1241 = vmatmul.mubr.msk.f32.gmra.mrb[4].mxu1 %vm562_vm1, %v424_v5 }
  0x4e   : > { %1243 = vmatprep.mubr.msk.f32.mxu1 %vm562_vm1, %v425_v6 }
  0x51   : > { %1244 = vmatmul.mubr.msk.f32.gmra.mrb[6].mxu1 %vm562_vm1, %v426_v9 }
  0x52   : > { %1246 = vmatprep.mubr.msk.f32.mxu1 %vm562_vm1, %v427_v10 }
  0x55   : > { %1247 = vmatmul.mubr.msk.f32.gmra.mrb[8].mxu1 %vm562_vm1, %v428_v13 }
  0x56   : > { %1249 = vmatprep.mubr.msk.f32.mxu1 %vm562_vm1, %v429_v16 }
  0x59   : > { %1250 = vmatmul.mubr.msk.f32.gmra.mrb[10].mxu1 %vm562_vm1, %v430_v17 }
  0xa7   : > { %v468_v24 = vpop.permute.xlu1 %467  ;;  %v458_v26 = vpop.permute.xlu0 %457 }
  0xab   : > { %v473_v29 = vpop.permute.xlu1 %472 }
  0xac   : > { %v463_v31 = vpop.permute.xlu0 %462 }
  0xaf   : > { %v483_v40 = vpop.permute.xlu1 %482 }
  0xb1   : > { %v478_v43 = vpop.permute.xlu0 %477 }
  0xb3   : > { %v493_v57 = vpop.permute.xlu1 %492 }
  0xb5   : > { %v488_v60 = vpop.permute.xlu0 %487 }
  0xb7   : > { %v527_v6 = vpop.permute.xlu1 %526 }
  0xb9   : > { %v522_v10 = vpop.permute.xlu0 %521 }
 0x107   : > { %v1262_v18 = vpop.f32.mrb[0].mxu0 }
 0x108   : > { %v855_v21 = vpop.f32.mrb[1].mxu0 }
 0x10b   : > { %v1265_v22 = vpop.f32.mrb[2].mxu0 }
 0x10c   : > { %v865_v23 = vpop.f32.mrb[3].mxu0 }
 0x10f   : > { %v1268_v27 = vpop.f32.mrb[4].mxu0 }
 0x110   : > { %v875_v28 = vpop.f32.mrb[5].mxu0 }
 0x113   : > { %v1271_v30 = vpop.f32.mrb[6].mxu0 }
 0x114   : > { %v885_v32 = vpop.f32.mrb[7].mxu0 }
 0x117   : > { %v1762_v37 = vpop.f32.mrb[8].mxu0 }
 0x118   : > { %v1236_v33 = vpop.f32.mrb[0].mxu1  ;;  %v1764_v39 = vpop.f32.mrb[9].mxu0 }
 0x119   : > { %v671_v34 = vadd.f32 %v1236_v33, %v463_v31  ;;  %v665_v35 = vpop.f32.mrb[1].mxu1 }
 0x11a   : > { %v666_v36 = vadd.f32 %v665_v35, %v458_v26  ;;  %v537_v26 = vpop.permute.xlu1 %536 }
 0x11b   : > { %v915_v38 = vadd.f32 %v1262_v18, %v671_v34  ;;  %v1766_v49 = vpop.f32.mrb[10].mxu0 }
 0x11c   : > { %v914_v41 = vadd.f32 %v855_v21, %v666_v36  ;;  %v1239_v42 = vpop.f32.mrb[2].mxu1  ;;  %v1768_v51 = vpop.f32.mrb[11].mxu0  ;;  %v971_v36 = vadd.f32 %v1762_v37, %v527_v6 }
 0x11d   : > { %v1170_v44 = vmul.f32 -1.442695, %v915_v38  ;;  %v681_v45 = vadd.f32 %v1239_v42, %v473_v29  ;;  %v675_v46 = vpop.f32.mrb[3].mxu1 }
 0x11e   : > { %v1169_v47 = vmul.f32 -1.442695, %v914_v41  ;;  %v676_v48 = vadd.f32 %v675_v46, %v468_v24  ;;  %v970_v41 = vadd.f32 %v1764_v39, %v522_v10 }
 0x11f   : > { %1363 = vpow2.f32 %v1170_v44  ;;  %v917_v50 = vadd.f32 %v1265_v22, %v681_v45 }
 0x120   : > { %1365 = vpow2.f32 %v1169_v47  ;;  %v916_v52 = vadd.f32 %v865_v23, %v676_v48  ;;  %v1242_v53 = vpop.f32.mrb[4].mxu1 }
 0x121   : > { %v1172_v54 = vmul.f32 -1.442695, %v917_v50  ;;  %v691_v55 = vadd.f32 %v1242_v53, %v483_v40  ;;  %v685_v56 = vpop.f32.mrb[5].mxu1  ;;  %v973_v50 = vadd.f32 %v1766_v49, %v537_v26 }
 0x122   : > { %v1171_v58 = vmul.f32 -1.442695, %v916_v52  ;;  %v686_v59 = vadd.f32 %v685_v56, %v478_v43 }
 0x123   : > { %1367 = vpow2.f32 %v1172_v54  ;;  %v943_v61 = vadd.f32 %v1268_v27, %v691_v55 }
 0x124   : > { %1369 = vpow2.f32 %v1171_v58  ;;  %v942_v62 = vadd.f32 %v875_v28, %v686_v59  ;;  %v1245_v63 = vpop.f32.mrb[6].mxu1  ;;  %v532_v28 = vpop.permute.xlu0 %531 }
 0x125   : > { %v1174_v0 = vmul.f32 -1.442695, %v943_v61  ;;  %v701_v1 = vadd.f32 %v1245_v63, %v493_v57  ;;  %v695_v2 = vpop.f32.mrb[7].mxu1  ;;  %v972_v37 = vadd.f32 %v1768_v51, %v532_v28 }
 0x126   : > { %v1173_v3 = vmul.f32 -1.442695, %v942_v62  ;;  %v696_v4 = vadd.f32 %v695_v2, %v488_v60 }
 0x127   : > { %1371 = vpow2.f32 %v1174_v0  ;;  %v945_v5 = vadd.f32 %v1271_v30, %v701_v1 }
 0x128   : > { %1373 = vpow2.f32 %v1173_v3  ;;  %v944_v7 = vadd.f32 %v885_v32, %v696_v4  ;;  %v1248_v8 = vpop.f32.mrb[8].mxu1  ;;  %v503_v32 = vpop.permute.xlu1 %502 }
 0x129   : > { %v1364_v9 = vpop.eup %1363  ;;  %v1176_v11 = vmul.f32 -1.442695, %v945_v5  ;;  %v705_v12 = vpop.f32.mrb[9].mxu1  ;;  %v711_v45 = vadd.f32 %v1248_v8, %v503_v32 }
 0x12a   : > { %v1366_v13 = vpop.eup %1365  ;;  %v931_v16 = vadd.f32 1.0, %v1364_v9  ;;  %v1175_v17 = vmul.f32 -1.442695, %v944_v7  ;;  %v498_v35 = vpop.permute.xlu0 %497 }
 0x12b   : > { %v930_v18 = vadd.f32 1.0, %v1366_v13  ;;  %1375 = vpow2.f32 %v1176_v11  ;;  %v706_v48 = vadd.f32 %v705_v12, %v498_v35 }
 0x12c   : > { %1377 = vrcp.f32 %v931_v16  ;;  %v1251_v21 = vpop.f32.mrb[10].mxu1  ;;  %v513_v55 = vpop.permute.xlu1 %512 }
 0x12d   : > { %v1368_v22 = vpop.eup %1367  ;;  %1379 = vrcp.f32 %v930_v18  ;;  %v715_v23 = vpop.f32.mrb[11].mxu1  ;;  %v721_v59 = vadd.f32 %v1251_v21, %v513_v55 }
 0x12e   : > { %v1370_v24 = vpop.eup %1369  ;;  %v933_v27 = vadd.f32 1.0, %v1368_v22  ;;  %1381 = vpow2.f32 %v1175_v17  ;;  %v508_v57 = vpop.permute.xlu0 %507 }
 0x12f   : > { %v932_v29 = vadd.f32 1.0, %v1370_v24  ;;  %v716_v61 = vadd.f32 %v715_v23, %v508_v57 }
 0x130   : > { %1383 = vrcp.f32 %v933_v27 }
 0x131   : > { %v1372_v30 = vpop.eup %1371  ;;  %1385 = vrcp.f32 %v932_v29 }
 0x132   : > { %v1374_v31 = vpop.eup %1373  ;;  %v959_v33 = vadd.f32 1.0, %v1372_v30 }
 0x133   : > { %v958_v38 = vadd.f32 1.0, %v1374_v31 }
 0x134   : > { %1387 = vrcp.f32 %v959_v33 }
 0x135   : > { %v1376_v34 = vpop.eup %1375  ;;  %1389 = vrcp.f32 %v958_v38 }
 0x136   : > { %v1378_v40 = vpop.eup %1377  ;;  %v961_v42 = vadd.f32 1.0, %v1376_v34 }
 0x137   : > { %v1380_v43 = vpop.eup %1379  ;;  %v975_v44 = vmul.f32 %v1378_v40, %v971_v36 }
 0x138   : > { %v1382_v46 = vpop.eup %1381  ;;  %v974_v47 = vmul.f32 %v1380_v43, %v970_v41  ;;  %1391 = vrcp.f32 %v961_v42 }
 0x139   : > { %v960_v52 = vadd.f32 1.0, %v1382_v46  ;;  %v979_v53 = vadd.f32 %v975_v44, %v711_v45 }
 0x13a   : > { %v1384_v54 = vpop.eup %1383  ;;  %v978_v56 = vadd.f32 %v974_v47, %v706_v48 }
 0x13b   : > { %v1386_v39 = vpop.eup %1385  ;;  %v977_v58 = vmul.f32 %v1384_v54, %v973_v50  ;;  %1393 = vrcp.f32 %v960_v52 }
 0x13c   : > { %v976_v60 = vmul.f32 %v1386_v39, %v972_v37  ;;  %1395 = vtanh.f32 %v979_v53 }
 0x13d   : > { %1397 = vtanh.f32 %v978_v56  ;;  %v981_v62 = vadd.f32 %v977_v58, %v721_v59 }
 0x13e   : > { %v980_v49 = vadd.f32 %v976_v60, %v716_v61  ;;  %v1388_v63 = vpop.eup %1387 }
 0x13f   : > { %1399 = vtanh.f32 %v981_v62  ;;  %v1390_v0 = vpop.eup %1389  ;;  %v987_v51 = vsub.f32 1.0, %v1388_v63  ;;  %v995_v6 = vmul.f32 %v1388_v63, %v1599_v15 }
 0x140   : > { %1401 = vtanh.f32 %v980_v49  ;;  %v986_v4 = vsub.f32 1.0, %v1390_v0  ;;  %v994_v8 = vmul.f32 %v1390_v0, %v1597_v14 }
 0x142   : > { %v1392_v1 = vpop.eup %1391 }
 0x143   : > { %v989_v10 = vsub.f32 1.0, %v1392_v1  ;;  %v997_v17 = vmul.f32 %v1392_v1, %v1609_v20 }
 0x145   : > { %v1394_v2 = vpop.eup %1393 }
 0x146   : > { %v1396_v3 = vpop.eup %1395  ;;  %v988_v13 = vsub.f32 1.0, %v1394_v2  ;;  %v996_v22 = vmul.f32 %v1394_v2, %v1607_v19 }
 0x147   : > { %v1398_v5 = vpop.eup %1397  ;;  %v991_v7 = vmul.f32 %v1396_v3, %v987_v51 }
 0x148   : > { %v990_v9 = vmul.f32 %v1398_v5, %v986_v4 }
 0x149   : > { %v1400_v11 = vpop.eup %1399  ;;  %v999_v12 = vadd.f32 %v995_v6, %v991_v7 }
 0x14a   : > { %v1402_v16 = vpop.eup %1401  ;;  %v998_v18 = vadd.f32 %v994_v8, %v990_v9  ;;  %v993_v21 = vmul.f32 %v1400_v11, %v989_v10 }
 0x14b   : > { %v1018_v15 = vmul.f32 %v1616_v25, %v999_v12  ;;  %v992_v23 = vmul.f32 %v1402_v16, %v988_v13 }
 0x14c   : > { %v1017_v14 = vmul.f32 %v1616_v25, %v998_v18  ;;  %v1001_v24 = vadd.f32 %v997_v17, %v993_v21 }
 0x14d   : > { %1022 = vst [vmem:[%s415_s20 + $0x8] sm:$0xff] %v1018_v15  ;;  %v1000_v26 = vadd.f32 %v996_v22, %v992_v23 }
 0x14e   : > { %1021 = vst [vmem:[%s415_s20] sm:$0xff] %v1017_v14  ;;  %v1020_v19 = vmul.f32 %v1616_v25, %v1001_v24 }
 0x14f   : > { %v1019_v20 = vmul.f32 %v1616_v25, %v1000_v26 }
 0x150   : > { %1024 = vst [vmem:[%s415_s20 + $0x18] sm:$0xff] %v1020_v19 }
 0x151   : > { %1023 = vst [vmem:[%s415_s20 + $0x10] sm:$0xff] %v1019_v20 }
 0x152   : > { %1416 = shalt.err (!%p1413_p7)
}
 0x153   : > { %s1417_s15 = scalar_lea.hbm %s1786_s29, 512  ;;  %s1421_s19 = scalar_lea.hbm %s1841_s7, 1024 }
 0x154   : > { %p1418_p10 = scmp.ne.s32.totalorder %s1786_s29, %s1417_s15  ;;  %p1422_p13 = scmp.lt.u32.totalorder %s1786_s29, %s1841_s7 }
 0x155   : > { %p1423_p0 = scmp.lt.u32.totalorder %s1421_s19, %s1417_s15  ;;  %p1425_p2 = scmp.lt.u32.totalorder %s1417_s15, %s1786_s29 }
 0x156   : > { %p1419_p11 = pnand %p1418_p10, %p1555_p6 }
 0x157   : > { %p1424_p1 = por %p1423_p0, %p1422_p13 }
 0x158   : > { %p1420_p12 = pneg %p1419_p11 }
 0x159   : > { %p1426_p3 = por %p1425_p2, %p1424_p1 }
 0x15b   : > { %p1427_p4 = pnand %p1426_p3, %p1420_p12 }
 0x15d   : > { %1430 = shalt.err (!%p1427_p4)
}
 0x15e   : > { %s1469_s23 = smov 128   ;;  %s1470_s18 = smov 256  }
 0x15f   : > { %s1471_s8 = smov 8  }
 0x160   : > { %1318 = dma.vmem_to_hbm [thread:$0]  (%p1555_p6), %s1789_s21, 512, %s1786_s29, %s1026_s28, %s1469_s23, %s1470_s18, %s1471_s8  }
 0x161 PF: > { %s1053_s9 = sand.u32 1, %s1453_s24   ;;  %p1321_p5 = pnand %p1135_p9, %p1559_p8 }
 0x162   : > { %s1054_s14 = scalar_lea.sflag [#allocation6], %s1053_s9 }
 0x163   : > { %1448 = dma.done.wait (!%p1321_p5), %s1054_s14, 512  }
 0x164   : > { %1450 = vsyncadd (!%p1321_p5), %s1054_s14, 4294966784  ;;  %p17_p7 = scmp.ge.s32.totalorder %s1537_s30, 4   ;;  %s1845_s24 = smov %s1457_s25 }
 0x165   : > { %s1846_s25 = smov %s1461_s26  ;;  %s1847_s26 = smov %s1549_s10 }
 0x166   : > { %s1848_s27 = smov %s1537_s30  ;;  %19 = sbr.rel (!%p17_p7) target bundleno = 3 (0x3), region = 175 }
 0x16d   :  { %1059 = vsyncpa [#allocation6], 1 }
 0x16e   :  { %1061 = vsyncpa [#allocation6 + $0x1], 1 }

</bundles_post_ra>
